<compile_context>
chip_gen: v5e
topology: v5e:2x2
jax: 0.10.0
libtpu: 0.0.40
codegen_flags: <defaults>
</compile_context>

<pallas_src>
import jax
import jax.numpy as jnp
from jax.experimental import pallas as pl
from jax.experimental.pallas import tpu as pltpu


def _round_up(n, m):
    return ((n + m - 1) // m) * m


# ----------------------------------------------------------------------------
# Kernel: four chained matmuls (MXU, bf16 in / f32 accumulate) with the folded
# BN bias adds and ReLU in f32 on the VPU (v5e VPU has no bf16 path).
# ----------------------------------------------------------------------------
def _mlp_kernel(x_ref,
                w1_ref, b1_ref,
                w2_ref, b2_ref,
                w3_ref, b3_ref,
                w4_ref, b4_ref,
                o_ref):
    x = x_ref[...]  # bf16 (TM, K_pad)

    h = jnp.dot(x, w1_ref[...], preferred_element_type=jnp.float32) + b1_ref[...]
    h = jnp.maximum(h, 0.0).astype(jnp.bfloat16)

    h = jnp.dot(h, w2_ref[...], preferred_element_type=jnp.float32) + b2_ref[...]
    h = jnp.maximum(h, 0.0).astype(jnp.bfloat16)

    h = jnp.dot(h, w3_ref[...], preferred_element_type=jnp.float32) + b3_ref[...]
    h = jnp.maximum(h, 0.0).astype(jnp.bfloat16)

    o = jnp.dot(h, w4_ref[...], preferred_element_type=jnp.float32) + b4_ref[...]
    o_ref[...] = o.astype(o_ref.dtype)  # bf16 writeback (lane-dense)


# ----------------------------------------------------------------------------
# One-time parameter prep (do NOT call per forward pass):
#   - fold eval-mode BatchNorm into the preceding Linear:
#       (xW + b)*s + t == x(W*s) + (b*s + t)
#   - zero-pad feature / class dims to multiples of 128 (lane-dense)
#   - cast matmul operands to bf16; biases stay f32 for the VPU epilogue
# ----------------------------------------------------------------------------
def fold_and_pad_params(params, input_dim, num_classes):
    K = _round_up(input_dim, 128)    # padded input features
    C = _round_up(num_classes, 128)  # padded logits (unmasked vst)

    w1 = params["w1"] * params["s1"]
    b1 = params["b1"] * params["s1"] + params["t1"]
    w2 = params["w2"] * params["s2"]
    b2 = params["b2"] * params["s2"] + params["t2"]
    w3 = params["w3"] * params["s3"]
    b3 = params["b3"] * params["s3"] + params["t3"]
    w4 = params["w4"]
    b4 = params["b4"]

    # Zero-pad w1 rows so padded x columns contribute nothing; pad w4/b4
    # columns out to the lane-dense logits width.
    w1p = jnp.pad(w1, ((0, K - input_dim), (0, 0))).astype(jnp.bfloat16)
    w4p = jnp.pad(w4, ((0, 0), (0, C - num_classes))).astype(jnp.bfloat16)
    b4p = jnp.pad(b4, ((0, 0), (0, C - num_classes)))

    return {
        "w1": w1p, "b1": b1,
        "w2": w2.astype(jnp.bfloat16), "b2": b2,
        "w3": w3.astype(jnp.bfloat16), "b3": b3,
        "w4": w4p, "b4": b4p,
        "input_dim": input_dim, "num_classes": num_classes,
        "K": K, "C": C,
    }


# ----------------------------------------------------------------------------
# Forward wrapper: only pads the activation and launches the kernel.
# ----------------------------------------------------------------------------
def mlp_forward(x, folded, *, tm_max=512):
    """x: (B, input_dim) float32.  folded: output of fold_and_pad_params.

    Returns bf16 logits of shape (B, num_classes); cast in the caller if f32
    logits are required.
    """
    B = x.shape[0]
    input_dim = folded["input_dim"]
    num_classes = folded["num_classes"]
    K, C = folded["K"], folded["C"]

    # Batch tile: multiple of 16 (bf16 sublane packing).  For large batches cap
    # at tm_max and split so the "parallel" grid axis has >=2 steps (keeps both
    # v7x TensorCores busy; harmless on v5e/v6e).
    B16 = _round_up(B, 16)
    if B16 <= tm_max:
        TM = B16
        if B16 >= 256:
            TM = _round_up((B16 + 1) // 2, 16)
    else:
        TM = tm_max
    Bp = _round_up(B16, TM)

    # Single-op pad + cast of the activation (no f32 intermediate).
    xp = jnp.pad(x.astype(jnp.bfloat16), ((0, Bp - B), (0, K - input_dim)))

    grid = (Bp // TM,)

    def const_spec(a):
        # Constant block index -> VMEM-resident across all grid steps.
        return pl.BlockSpec(a.shape, lambda i: (0, 0))

    H1 = folded["w1"].shape[1]
    H2 = folded["w2"].shape[1]
    H3 = folded["w3"].shape[1]
    flops = 2 * Bp * (K * H1 + H1 * H2 + H2 * H3 + H3 * C)
    bytes_accessed = (
        Bp * K * 2                                        # x (bf16)
        + (K * H1 + H1 * H2 + H2 * H3 + H3 * C) * 2       # weights (bf16)
        + (H1 + H2 + H3 + C) * 4                          # biases (f32)
        + Bp * C * 2                                      # logits (bf16)
    )

    out = pl.pallas_call(
        _mlp_kernel,
        out_shape=jax.ShapeDtypeStruct((Bp, C), jnp.bfloat16),
        grid=grid,
        in_specs=[
            pl.BlockSpec((TM, K), lambda i: (i, 0)),       # x tile
            const_spec(folded["w1"]), const_spec(folded["b1"]),
            const_spec(folded["w2"]), const_spec(folded["b2"]),
            const_spec(folded["w3"]), const_spec(folded["b3"]),
            const_spec(folded["w4"]), const_spec(folded["b4"]),
        ],
        out_specs=pl.BlockSpec((TM, C), lambda i: (i, 0)),
        compiler_params=pltpu.CompilerParams(
            dimension_semantics=("parallel",)),
        cost_estimate=pl.CostEstimate(
            flops=flops, transcendentals=0, bytes_accessed=bytes_accessed),
    )(xp, folded["w1"], folded["b1"], folded["w2"], folded["b2"],
      folded["w3"], folded["b3"], folded["w4"], folded["b4"])

    return out[:B, :num_classes]


# ----------------------------------------------------------------------------
# Deterministic synthetic parameters matching the PyTorch module's shapes.
# ----------------------------------------------------------------------------
def init_params(key, input_dim, num_classes, eps=1e-5):
    dims = [input_dim, 512, 256, 128, num_classes]
    keys = jax.random.split(key, 16)
    params = {}
    ki = 0
    for li in range(4):
        fan_in, fan_out = dims[li], dims[li + 1]
        bound = 1.0 / jnp.sqrt(fan_in)
        w = jax.random.uniform(keys[ki], (fan_in, fan_out), jnp.float32, -bound, bound)
        ki += 1
        b = jax.random.uniform(keys[ki], (1, fan_out), jnp.float32, -bound, bound)
        ki += 1
        params[f"w{li + 1}"] = w
        params[f"b{li + 1}"] = b
        if li < 3:  # BatchNorm1d after the first three Linears
            gamma = 1.0 + 0.1 * jax.random.normal(keys[ki], (1, fan_out), jnp.float32)
            ki += 1
            beta = 0.1 * jax.random.normal(keys[ki], (1, fan_out), jnp.float32)
            ki += 1
            run_mean = 0.05 * jnp.arange(fan_out, dtype=jnp.float32).reshape(1, fan_out) / fan_out
            run_var = (jnp.ones((1, fan_out), jnp.float32)
                       + 0.01 * jnp.arange(fan_out, dtype=jnp.float32).reshape(1, fan_out) / fan_out)
            scale = gamma / jnp.sqrt(run_var + eps)
            shift = beta - run_mean * scale
            params[f"s{li + 1}"] = scale
            params[f"t{li + 1}"] = shift
    return params


def mlp_reference_f32(x, params):
    """Pure-f32 eval-mode reference (module semantics)."""
    h = jnp.maximum((x @ params["w1"] + params["b1"]) * params["s1"] + params["t1"], 0.0)
    h = jnp.maximum((h @ params["w2"] + params["b2"]) * params["s2"] + params["t2"], 0.0)
    h = jnp.maximum((h @ params["w3"] + params["b3"]) * params["s3"] + params["t3"], 0.0)
    return h @ params["w4"] + params["b4"]


def mlp_reference_bf16(x, params):
    """Pure-JAX reference mimicking the kernel's bf16-matmul / f32-accumulate path."""
    bf = jnp.bfloat16

    def dot(a, b):
        return jnp.dot(a.astype(bf), b.astype(bf), preferred_element_type=jnp.float32)

    w1 = params["w1"] * params["s1"]; b1 = params["b1"] * params["s1"] + params["t1"]
    w2 = params["w2"] * params["s2"]; b2 = params["b2"] * params["s2"] + params["t2"]
    w3 = params["w3"] * params["s3"]; b3 = params["b3"] * params["s3"] + params["t3"]
    h = jnp.maximum(dot(x, w1) + b1, 0.0)
    h = jnp.maximum(dot(h, w2) + b2, 0.0)
    h = jnp.maximum(dot(h, w3) + b3, 0.0)
    return dot(h, params["w4"]) + params["b4"]


if __name__ == "__main__":
    key = jax.random.PRNGKey(0)
    k_x, k_p = jax.random.split(key)

    batch = 8
    input_dim = 64      # symptom vector + scaled numerics + binaries + one-hot cats
    num_classes = 16    # number of disease classes

    x = jax.random.normal(k_x, (batch, input_dim), jnp.float32)
    params = init_params(k_p, input_dim, num_classes)

    # One-time prep (model load time), NOT per call.
    folded = fold_and_pad_params(params, input_dim, num_classes)
    folded = jax.tree_util.tree_map(
        lambda a: jax.block_until_ready(a) if isinstance(a, jax.Array) else a, folded)

    out = mlp_forward(x, folded)
    out = jax.block_until_ready(out)
    assert out.shape == (batch, num_classes)
    out_f32 = out.astype(jnp.float32)

    # Tight check against a reference with the same bf16-matmul precision path
    # (tolerance allows for the final bf16 writeback rounding).
    ref_bf16 = mlp_reference_bf16(x, params)
    assert jnp.allclose(out_f32, ref_bf16, atol=3e-2, rtol=3e-2), "mismatch vs bf16-path reference"

    # Loose sanity check against the full-f32 eval-mode module semantics.
    ref_f32 = mlp_reference_f32(x, params)
    assert jnp.allclose(out_f32, ref_f32, atol=1e-1, rtol=1e-1), "mismatch vs f32 reference"

    print("KERNEL_OK")
</pallas_src>

<mosaic_0001>
module attributes {stable_mosaic.version = 11 : i64} {
  func.func @_mlp_kernel(%arg0: i32, %arg1: memref<16x128xbf16, #tpu.memory_space<vmem>>, %arg2: memref<128x512xbf16, #tpu.memory_space<vmem>>, %arg3: memref<1x512xf32, #tpu.memory_space<vmem>>, %arg4: memref<512x256xbf16, #tpu.memory_space<vmem>>, %arg5: memref<1x256xf32, #tpu.memory_space<vmem>>, %arg6: memref<256x128xbf16, #tpu.memory_space<vmem>>, %arg7: memref<1x128xf32, #tpu.memory_space<vmem>>, %arg8: memref<128x128xbf16, #tpu.memory_space<vmem>>, %arg9: memref<1x128xf32, #tpu.memory_space<vmem>>, %arg10: memref<16x128xbf16, #tpu.memory_space<vmem>>) attributes {dimension_semantics = [#tpu.dimension_semantics<parallel>], iteration_bounds = array<i64: 1>, scalar_prefetch = 0 : i64, scratch_operands = 0 : i64, tpu.core_type = #tpu.core_type<tc>, window_params = [{transform_indices = @transform_0, window_bounds = array<i64: 16, 128>}, {pipeline_mode = #tpu.pipeline_mode<synchronous>, transform_indices = @transform_1, window_bounds = array<i64: 128, 512>}, {pipeline_mode = #tpu.pipeline_mode<synchronous>, transform_indices = @transform_2, window_bounds = array<i64: 1, 512>}, {pipeline_mode = #tpu.pipeline_mode<synchronous>, transform_indices = @transform_3, window_bounds = array<i64: 512, 256>}, {pipeline_mode = #tpu.pipeline_mode<synchronous>, transform_indices = @transform_4, window_bounds = array<i64: 1, 256>}, {pipeline_mode = #tpu.pipeline_mode<synchronous>, transform_indices = @transform_5, window_bounds = array<i64: 256, 128>}, {pipeline_mode = #tpu.pipeline_mode<synchronous>, transform_indices = @transform_6, window_bounds = array<i64: 1, 128>}, {pipeline_mode = #tpu.pipeline_mode<synchronous>, transform_indices = @transform_7, window_bounds = array<i64: 128, 128>}, {pipeline_mode = #tpu.pipeline_mode<synchronous>, transform_indices = @transform_8, window_bounds = array<i64: 1, 128>}, {transform_indices = @transform_9, window_bounds = array<i64: 16, 128>}]} {
    %c0 = arith.constant 0 : index
    %c0_0 = arith.constant 0 : index
    %0 = vector.load %arg1[%c0, %c0_0] : memref<16x128xbf16, #tpu.memory_space<vmem>>, vector<16x128xbf16>
    %c0_1 = arith.constant 0 : index
    %c0_2 = arith.constant 0 : index
    %1 = vector.load %arg2[%c0_1, %c0_2] : memref<128x512xbf16, #tpu.memory_space<vmem>>, vector<128x512xbf16>
    %cst = arith.constant dense<0.000000e+00> : vector<16x512xf32>
    %2 = tpu.matmul %0, %1, %cst {dimension_numbers = #tpu.dot_dimension_numbers<[1], [0], [0], [1], [0, 0, 1, 1], [], []>} : vector<16x128xbf16>, vector<128x512xbf16>, vector<16x512xf32> -> vector<16x512xf32>
    %c0_3 = arith.constant 0 : index
    %c0_4 = arith.constant 0 : index
    %3 = vector.load %arg3[%c0_3, %c0_4] : memref<1x512xf32, #tpu.memory_space<vmem>>, vector<1x512xf32>
    %4 = vector.broadcast %3 : vector<1x512xf32> to vector<16x512xf32>
    %5 = arith.addf %2, %4 : vector<16x512xf32>
    %cst_5 = arith.constant 0.000000e+00 : f32
    %6 = vector.broadcast %cst_5 : f32 to vector<16x512xf32>
    %7 = arith.maximumf %5, %6 : vector<16x512xf32>
    %8 = arith.truncf %7 : vector<16x512xf32> to vector<16x512xbf16>
    %c0_6 = arith.constant 0 : index
    %c0_7 = arith.constant 0 : index
    %9 = vector.load %arg4[%c0_6, %c0_7] : memref<512x256xbf16, #tpu.memory_space<vmem>>, vector<512x256xbf16>
    %cst_8 = arith.constant dense<0.000000e+00> : vector<16x256xf32>
    %10 = tpu.matmul %8, %9, %cst_8 {dimension_numbers = #tpu.dot_dimension_numbers<[1], [0], [0], [1], [0, 0, 1, 1], [], []>} : vector<16x512xbf16>, vector<512x256xbf16>, vector<16x256xf32> -> vector<16x256xf32>
    %c0_9 = arith.constant 0 : index
    %c0_10 = arith.constant 0 : index
    %11 = vector.load %arg5[%c0_9, %c0_10] : memref<1x256xf32, #tpu.memory_space<vmem>>, vector<1x256xf32>
    %12 = vector.broadcast %11 : vector<1x256xf32> to vector<16x256xf32>
    %13 = arith.addf %10, %12 : vector<16x256xf32>
    %cst_11 = arith.constant 0.000000e+00 : f32
    %14 = vector.broadcast %cst_11 : f32 to vector<16x256xf32>
    %15 = arith.maximumf %13, %14 : vector<16x256xf32>
    %16 = arith.truncf %15 : vector<16x256xf32> to vector<16x256xbf16>
    %c0_12 = arith.constant 0 : index
    %c0_13 = arith.constant 0 : index
    %17 = vector.load %arg6[%c0_12, %c0_13] : memref<256x128xbf16, #tpu.memory_space<vmem>>, vector<256x128xbf16>
    %cst_14 = arith.constant dense<0.000000e+00> : vector<16x128xf32>
    %18 = tpu.matmul %16, %17, %cst_14 {dimension_numbers = #tpu.dot_dimension_numbers<[1], [0], [0], [1], [0, 0, 1, 1], [], []>} : vector<16x256xbf16>, vector<256x128xbf16>, vector<16x128xf32> -> vector<16x128xf32>
    %c0_15 = arith.constant 0 : index
    %c0_16 = arith.constant 0 : index
    %19 = vector.load %arg7[%c0_15, %c0_16] : memref<1x128xf32, #tpu.memory_space<vmem>>, vector<1x128xf32>
    %20 = vector.broadcast %19 : vector<1x128xf32> to vector<16x128xf32>
    %21 = arith.addf %18, %20 : vector<16x128xf32>
    %cst_17 = arith.constant 0.000000e+00 : f32
    %22 = vector.broadcast %cst_17 : f32 to vector<16x128xf32>
    %23 = arith.maximumf %21, %22 : vector<16x128xf32>
    %24 = arith.truncf %23 : vector<16x128xf32> to vector<16x128xbf16>
    %c0_18 = arith.constant 0 : index
    %c0_19 = arith.constant 0 : index
    %25 = vector.load %arg8[%c0_18, %c0_19] : memref<128x128xbf16, #tpu.memory_space<vmem>>, vector<128x128xbf16>
    %cst_20 = arith.constant dense<0.000000e+00> : vector<16x128xf32>
    %26 = tpu.matmul %24, %25, %cst_20 {dimension_numbers = #tpu.dot_dimension_numbers<[1], [0], [0], [1], [0, 0, 1, 1], [], []>} : vector<16x128xbf16>, vector<128x128xbf16>, vector<16x128xf32> -> vector<16x128xf32>
    %c0_21 = arith.constant 0 : index
    %c0_22 = arith.constant 0 : index
    %27 = vector.load %arg9[%c0_21, %c0_22] : memref<1x128xf32, #tpu.memory_space<vmem>>, vector<1x128xf32>
    %28 = vector.broadcast %27 : vector<1x128xf32> to vector<16x128xf32>
    %29 = arith.addf %26, %28 : vector<16x128xf32>
    %30 = arith.truncf %29 : vector<16x128xf32> to vector<16x128xbf16>
    %c0_23 = arith.constant 0 : index
    %c0_24 = arith.constant 0 : index
    %31 = vector.load %arg10[%c0_23, %c0_24] : memref<16x128xbf16, #tpu.memory_space<vmem>>, vector<16x128xbf16>
    tpu.vector_store %arg10[%c0_23, %c0_24], %30 {strides = array<i32>} : memref<16x128xbf16, #tpu.memory_space<vmem>>, vector<16x128xbf16>,
    return
  }
  func.func @transform_0(%arg0: i32) -> (i32, i32) {
    %c0_i32 = arith.constant 0 : i32
    %c0_i32_0 = arith.constant 0 : i32
    return %arg0, %c0_i32 : i32, i32
  }
  func.func @transform_1(%arg0: i32) -> (i32, i32) {
    %c0_i32 = arith.constant 0 : i32
    %c0_i32_0 = arith.constant 0 : i32
    %c0_i32_1 = arith.constant 0 : i32
    return %c0_i32, %c0_i32_0 : i32, i32
  }
  func.func @transform_2(%arg0: i32) -> (i32, i32) {
    %c0_i32 = arith.constant 0 : i32
    %c0_i32_0 = arith.constant 0 : i32
    %c0_i32_1 = arith.constant 0 : i32
    return %c0_i32, %c0_i32_0 : i32, i32
  }
  func.func @transform_3(%arg0: i32) -> (i32, i32) {
    %c0_i32 = arith.constant 0 : i32
    %c0_i32_0 = arith.constant 0 : i32
    %c0_i32_1 = arith.constant 0 : i32
    return %c0_i32, %c0_i32_0 : i32, i32
  }
  func.func @transform_4(%arg0: i32) -> (i32, i32) {
    %c0_i32 = arith.constant 0 : i32
    %c0_i32_0 = arith.constant 0 : i32
    %c0_i32_1 = arith.constant 0 : i32
    return %c0_i32, %c0_i32_0 : i32, i32
  }
  func.func @transform_5(%arg0: i32) -> (i32, i32) {
    %c0_i32 = arith.constant 0 : i32
    %c0_i32_0 = arith.constant 0 : i32
    %c0_i32_1 = arith.constant 0 : i32
    return %c0_i32, %c0_i32_0 : i32, i32
  }
  func.func @transform_6(%arg0: i32) -> (i32, i32) {
    %c0_i32 = arith.constant 0 : i32
    %c0_i32_0 = arith.constant 0 : i32
    %c0_i32_1 = arith.constant 0 : i32
    return %c0_i32, %c0_i32_0 : i32, i32
  }
  func.func @transform_7(%arg0: i32) -> (i32, i32) {
    %c0_i32 = arith.constant 0 : i32
    %c0_i32_0 = arith.constant 0 : i32
    %c0_i32_1 = arith.constant 0 : i32
    return %c0_i32, %c0_i32_0 : i32, i32
  }
  func.func @transform_8(%arg0: i32) -> (i32, i32) {
    %c0_i32 = arith.constant 0 : i32
    %c0_i32_0 = arith.constant 0 : i32
    %c0_i32_1 = arith.constant 0 : i32
    return %c0_i32, %c0_i32_0 : i32, i32
  }
  func.func @transform_9(%arg0: i32) -> (i32, i32) {
    %c0_i32 = arith.constant 0 : i32
    %c0_i32_0 = arith.constant 0 : i32
    return %arg0, %c0_i32 : i32, i32
  }
}

</mosaic_0001>

<bundles_post_ra>
// kernel: tpu_custom_call.1
= control target key start
LH: loop header
LB: loop body
LE: loop exit
PB: predicated region body
PF: predicated region fallthrough
CT: control target
= control target key end

     0   :  { %14 = vsyncpa [#allocation3], 0  ;;  %s2090_s0 = inlined_call_operand.hbm [shape: bf16[16,128], index: 0, kind: input, shape index: {}]   ;;  %s2091_s1 = inlined_call_operand.hbm [shape: bf16[128,512], index: 1, kind: input, shape index: {}]   ;;  %s2092_s2 = inlined_call_operand.hbm [shape: f32[1,512], index: 2, kind: input, shape index: {}]   ;;  %s2093_s3 = inlined_call_operand.hbm [shape: bf16[512,256], index: 3, kind: input, shape index: {}]   ;;  %s2094_s4 = inlined_call_operand.vmem [shape: f32[1,256], index: 4, kind: input, shape index: {}]   ;;  %s2095_s5 = inlined_call_operand.hbm [shape: bf16[256,128], index: 5, kind: input, shape index: {}]   ;;  %s2096_s6 = inlined_call_operand.vmem [shape: f32[1,128], index: 6, kind: input, shape index: {}]   ;;  %s2097_s7 = inlined_call_operand.hbm [shape: bf16[128,128], index: 7, kind: input, shape index: {}]   ;;  %s2098_s8 = inlined_call_operand.vmem [shape: f32[1,128], index: 8, kind: input, shape index: {}]   ;;  %s2099_s9 = inlined_call_operand.hbm [shape: bf16[16,128], index: 9, kind: output, shape index: {}]  }
   0x1   :  { %15 = vsyncpa [#allocation6], 0 }
   0x2   :  { %16 = vsyncpa [#allocation9], 0 }
   0x3   :  { %17 = vsyncpa [#allocation12], 0  ;;  %s36_s11 = sshll.u32 %s2091_s1, 4  ;;  %s37_s11 = int_to_ptr.hbm [resolvable:$true] %s36_s11 }
   0x4   :  { %18 = vsyncpa [#allocation4], 0  ;;  %s1985_s12 = smov [#allocation5]   ;;  %s60_s16 = sshll.u32 %s2093_s3, 4  ;;  %s61_s16 = int_to_ptr.hbm [resolvable:$true] %s60_s16 }
   0x5   :  { %s38_s13 = sshll.u32 %s1985_s12, 4  ;;  %s1986_s17 = smov 256   ;;  %s39_s13 = int_to_ptr.vmem [resolvable:$true] %s38_s13 }
   0x6   :  { %s1987_s18 = smov 16   ;;  %s1988_s19 = smov [#allocation8]  }
   0x7   :  { %44 = dma.hbm_to_vmem [thread:$0]  %s37_s11, 4096, %s39_s13, [#allocation6], %s1986_s17, %s1986_s17, %s1987_s18  }
   0x8   :  { %s62_s20 = sshll.u32 %s1988_s19, 4  ;;  %s1989_s21 = smov 128   ;;  %s63_s20 = int_to_ptr.vmem [resolvable:$true] %s62_s20 }
   0x9   :  { %s1990_s22 = smov 8   ;;  %s23_s24 = sshll.u32 %s2090_s0, 4  ;;  %s24_s24 = int_to_ptr.hbm [resolvable:$true] %s23_s24 }
   0xa   :  { %68 = dma.hbm_to_vmem [thread:$0]  %s61_s16, 8192, %s63_s20, [#allocation9], %s1989_s21, %s1989_s21, %s1990_s22  }
   0xb   :  { %s1991_s25 = smov [#allocation2]   ;;  %s50_s28 = sshll.u32 %s2092_s2, 4  ;;  %s51_s28 = int_to_ptr.hbm [resolvable:$true] %s50_s28 }
   0xc   :  { %s25_s26 = sshll.u32 %s1991_s25, 4  ;;  %s1992_s29 = smov 64   ;;  %s26_s26 = int_to_ptr.vmem [resolvable:$true] %s25_s26 }
   0xd   :  { %s1993_s30 = smov 4   ;;  %s1994_s10 = smov [#allocation7]  }
   0xe   :  { %31 = dma.hbm_to_vmem [thread:$0]  %s24_s24, 128, %s26_s26, [#allocation3], %s1992_s29, %s1992_s29, %s1993_s30  }
   0xf   :  { %s52_s11 = sshll.u32 %s1994_s10, 4  ;;  %s75_s0 = sshll.u32 %s2095_s5, 4  ;;  %s53_s11 = int_to_ptr.vmem [resolvable:$true] %s52_s11  ;;  %s76_s0 = int_to_ptr.hbm [resolvable:$true] %s75_s0 }
  0x10   :  { %55 = dma.hbm_to_vmem [thread:$0]  %s51_s28, 64, %s53_s11, [#allocation6]  }
  0x11   :  { %s90_s2 = sshll.u32 %s2097_s7, 4  ;;  %s1995_s16 = smov [#allocation10]   ;;  %s91_s2 = int_to_ptr.hbm [resolvable:$true] %s90_s2 }
  0x12   :  { %s77_s17 = sshll.u32 %s1995_s16, 4  ;;  %s1996_s18 = smov [#allocation11]   ;;  %s78_s17 = int_to_ptr.vmem [resolvable:$true] %s77_s17 }
  0x13   :  { %83 = dma.hbm_to_vmem [thread:$0]  %s76_s0, 2048, %s78_s17, [#allocation9], %s1992_s29, %s1992_s29, %s1993_s30  }
  0x14   :  { %s92_s19 = sshll.u32 %s1996_s18, 4  ;;  %s93_s19 = int_to_ptr.vmem [resolvable:$true] %s92_s19 }
  0x15   :  { %98 = dma.hbm_to_vmem [thread:$0]  %s91_s2, 1024, %s93_s19, [#allocation12], %s1992_s29, %s1992_s29, %s1993_s30  }
  0x16   :  { %1975 = dma.done.wait [#allocation3], 128  }
  0x17   :  { %1976 = vsyncadd [#allocation3], 4294967168 }
  0x18   :  { %1977 = dma.done.wait [#allocation6], 4160  }
  0x19   :  { %1978 = vsyncadd [#allocation6], 4294963136 }
  0x1a   :  { %1979 = dma.done.wait [#allocation9], 10240  }
  0x1b   :  { %1980 = vsyncadd [#allocation9], 4294957056 }
  0x1c   :  { %1981 = dma.done.wait [#allocation12], 1024  }
  0x1d   :  { %1982 = vsyncadd [#allocation12], 4294966272  ;;  %v1300_v0 = vld [vmem:[#allocation5 + $0xe0] sm:$0xf]  ;;  %v1697_v1 = vld [vmem:[#allocation5 + $0xec] sm:$0xf0] }
  0x1e   :  { %v1695_v2 = vld [vmem:[#allocation5 + $0xe4] sm:$0xf]  ;;  %v1301_v3 = vor.u32 %v1697_v1, %v1300_v0  ;;  %v1302_v4 = vld [vmem:[#allocation5 + $0xf0] sm:$0xf0]  ;;  %v1308_v5 = vld [vmem:[#allocation5 + $0xe8] sm:$0xf] }
  0x1f   :  { %v1698_v6 = vld [vmem:[#allocation5 + $0xf4] sm:$0xf0]  ;;  %v1305_v7 = vor.u32 %v1695_v2, %v1302_v4  ;;  %v1696_v9 = vld [vmem:[#allocation5 + $0xec] sm:$0xf]  ;;  %v1310_v10 = vld [vmem:[#allocation5 + $0xf8] sm:$0xf0] }
  0x20   :  { %v1309_v8 = vor.u32 %v1698_v6, %v1308_v5  ;;  %v1284_v11 = vld [vmem:[#allocation5 + $0xc0] sm:$0xf]  ;;  %335 = vmatpush.bf16.msra.mxu0 %v1301_v3  ;;  %v1313_v12 = vor.u32 %v1696_v9, %v1310_v10  ;;  %v1693_v13 = vld [vmem:[#allocation5 + $0xcc] sm:$0xf0]  ;;  %v1691_v14 = vld [vmem:[#allocation5 + $0xc4] sm:$0xf] }
  0x21   :  { %v1286_v15 = vld [vmem:[#allocation5 + $0xd0] sm:$0xf0]  ;;  %349 = vmatpush.bf16.msra.mxu1 %v1305_v7  ;;  %v1285_v16 = vor.u32 %v1693_v13, %v1284_v11  ;;  %v1292_v18 = vld [vmem:[#allocation5 + $0xc8] sm:$0xf]  ;;  %v1694_v19 = vld [vmem:[#allocation5 + $0xd4] sm:$0xf0] }
  0x22   :  { %363 = vmatpush.bf16.msra.mxu2 %v1309_v8  ;;  %v1289_v17 = vor.u32 %v1691_v14, %v1286_v15  ;;  %v1692_v20 = vld [vmem:[#allocation5 + $0xcc] sm:$0xf]  ;;  %377 = vmatpush.bf16.msra.mxu3 %v1313_v12  ;;  %v1293_v21 = vor.u32 %v1694_v19, %v1292_v18  ;;  %v1294_v22 = vld [vmem:[#allocation5 + $0xd8] sm:$0xf0]  ;;  %v1268_v23 = vld [vmem:[#allocation5 + $0xa0] sm:$0xf] }
  0x23   :  { %v1689_v24 = vld [vmem:[#allocation5 + $0xac] sm:$0xf0]  ;;  %v1297_v25 = vor.u32 %v1692_v20, %v1294_v22  ;;  %v1687_v26 = vld [vmem:[#allocation5 + $0xa4] sm:$0xf]  ;;  %v1270_v27 = vld [vmem:[#allocation5 + $0xb0] sm:$0xf0] }
  0x24   :  { %v1276_v28 = vld [vmem:[#allocation5 + $0xa8] sm:$0xf]  ;;  %336 = vmatpush.bf16.msra.mxu0 %v1285_v16  ;;  %v1269_v29 = vor.u32 %v1689_v24, %v1268_v23  ;;  %v1690_v30 = vld [vmem:[#allocation5 + $0xb4] sm:$0xf0]  ;;  %v1688_v31 = vld [vmem:[#allocation5 + $0xac] sm:$0xf]  ;;  %v1273_v33 = vor.u32 %v1687_v26, %v1270_v27 }
  0x25   :  { %v1278_v32 = vld [vmem:[#allocation5 + $0xb8] sm:$0xf0]  ;;  %350 = vmatpush.bf16.msra.mxu1 %v1289_v17  ;;  %v1277_v34 = vor.u32 %v1690_v30, %v1276_v28  ;;  %v1252_v35 = vld [vmem:[#allocation5 + $0x80] sm:$0xf]  ;;  %v1685_v36 = vld [vmem:[#allocation5 + $0x8c] sm:$0xf0] }
  0x26   :  { %364 = vmatpush.bf16.msra.mxu2 %v1293_v21  ;;  %v1683_v37 = vld [vmem:[#allocation5 + $0x84] sm:$0xf]  ;;  %378 = vmatpush.bf16.msra.mxu3 %v1297_v25  ;;  %v1281_v38 = vor.u32 %v1688_v31, %v1278_v32  ;;  %v1254_v39 = vld [vmem:[#allocation5 + $0x90] sm:$0xf0]  ;;  %v1260_v40 = vld [vmem:[#allocation5 + $0x88] sm:$0xf]  ;;  %v1253_v44 = vor.u32 %v1685_v36, %v1252_v35 }
  0x27   :  { %v1686_v41 = vld [vmem:[#allocation5 + $0x94] sm:$0xf0]  ;;  %v1684_v42 = vld [vmem:[#allocation5 + $0x8c] sm:$0xf]  ;;  %v1262_v43 = vld [vmem:[#allocation5 + $0x98] sm:$0xf0]  ;;  %v1257_v45 = vor.u32 %v1683_v37, %v1254_v39 }
  0x28   :  { %337 = vmatpush.bf16.msra.mxu0 %v1269_v29  ;;  %v1261_v46 = vor.u32 %v1686_v41, %v1260_v40  ;;  %v1236_v47 = vld [vmem:[#allocation5 + $0x60] sm:$0xf]  ;;  %v1681_v48 = vld [vmem:[#allocation5 + $0x6c] sm:$0xf0]  ;;  %v1679_v49 = vld [vmem:[#allocation5 + $0x64] sm:$0xf]  ;;  %v1265_v50 = vor.u32 %v1684_v42, %v1262_v43 }
  0x29   :  { %351 = vmatpush.bf16.msra.mxu1 %v1273_v33  ;;  %v1238_v51 = vld [vmem:[#allocation5 + $0x70] sm:$0xf0]  ;;  %v1244_v52 = vld [vmem:[#allocation5 + $0x68] sm:$0xf]  ;;  %v1682_v53 = vld [vmem:[#allocation5 + $0x74] sm:$0xf0]  ;;  %v1237_v56 = vor.u32 %v1681_v48, %v1236_v47 }
  0x2a   :  { %365 = vmatpush.bf16.msra.mxu2 %v1277_v34  ;;  %379 = vmatpush.bf16.msra.mxu3 %v1281_v38  ;;  %v1680_v54 = vld [vmem:[#allocation5 + $0x6c] sm:$0xf]  ;;  %v1246_v55 = vld [vmem:[#allocation5 + $0x78] sm:$0xf0]  ;;  %v1241_v57 = vor.u32 %v1679_v49, %v1238_v51  ;;  %v1245_v58 = vor.u32 %v1682_v53, %v1244_v52  ;;  %v1220_v59 = vld [vmem:[#allocation5 + $0x40] sm:$0xf] }
  0x2b   :  { %v1677_v60 = vld [vmem:[#allocation5 + $0x4c] sm:$0xf0]  ;;  %v1675_v61 = vld [vmem:[#allocation5 + $0x44] sm:$0xf]  ;;  %v1249_v62 = vor.u32 %v1680_v54, %v1246_v55  ;;  %v1222_v63 = vld [vmem:[#allocation5 + $0x50] sm:$0xf0] }
  0x2c   :  { %338 = vmatpush.bf16.msra.mxu0 %v1253_v44  ;;  %v1228_v0 = vld [vmem:[#allocation5 + $0x48] sm:$0xf]  ;;  %v1678_v1 = vld [vmem:[#allocation5 + $0x54] sm:$0xf0]  ;;  %v1676_v2 = vld [vmem:[#allocation5 + $0x4c] sm:$0xf]  ;;  %v1221_v4 = vor.u32 %v1677_v60, %v1220_v59  ;;  %v1225_v5 = vor.u32 %v1675_v61, %v1222_v63 }
  0x2d   :  { %352 = vmatpush.bf16.msra.mxu1 %v1257_v45  ;;  %v1230_v3 = vld [vmem:[#allocation5 + $0x58] sm:$0xf0]  ;;  %v1229_v6 = vor.u32 %v1678_v1, %v1228_v0  ;;  %v1204_v7 = vld [vmem:[#allocation5 + $0x20] sm:$0xf]  ;;  %v1673_v8 = vld [vmem:[#allocation5 + $0x2c] sm:$0xf0] }
  0x2e   :  { %366 = vmatpush.bf16.msra.mxu2 %v1261_v46  ;;  %380 = vmatpush.bf16.msra.mxu3 %v1265_v50  ;;  %v1671_v9 = vld [vmem:[#allocation5 + $0x24] sm:$0xf]  ;;  %v1233_v10 = vor.u32 %v1676_v2, %v1230_v3  ;;  %v1206_v11 = vld [vmem:[#allocation5 + $0x30] sm:$0xf0]  ;;  %v1212_v12 = vld [vmem:[#allocation5 + $0x28] sm:$0xf]  ;;  %v1205_v16 = vor.u32 %v1673_v8, %v1204_v7 }
  0x2f   :  { %v1674_v13 = vld [vmem:[#allocation5 + $0x34] sm:$0xf0]  ;;  %v1672_v14 = vld [vmem:[#allocation5 + $0x2c] sm:$0xf]  ;;  %v1214_v15 = vld [vmem:[#allocation5 + $0x38] sm:$0xf0]  ;;  %v1209_v18 = vor.u32 %v1671_v9, %v1206_v11 }
  0x30   :  { %339 = vmatpush.bf16.msra.mxu0 %v1237_v56  ;;  %v1188_v17 = vld [vmem:[#allocation5] sm:$0xf]  ;;  %v1213_v19 = vor.u32 %v1674_v13, %v1212_v12  ;;  %v1669_v20 = vld [vmem:[#allocation5 + $0xc] sm:$0xf0]  ;;  %v1667_v21 = vld [vmem:[#allocation5 + $0x4] sm:$0xf]  ;;  %v1217_v23 = vor.u32 %v1672_v14, %v1214_v15 }
  0x31   :  { %353 = vmatpush.bf16.msra.mxu1 %v1241_v57  ;;  %v1190_v22 = vld [vmem:[#allocation5 + $0x10] sm:$0xf0]  ;;  %v1196_v24 = vld [vmem:[#allocation5 + $0x8] sm:$0xf]  ;;  %v1670_v25 = vld [vmem:[#allocation5 + $0x14] sm:$0xf0]  ;;  %v1189_v30 = vor.u32 %v1669_v20, %v1188_v17 }
  0x32   :  { %367 = vmatpush.bf16.msra.mxu2 %v1245_v58  ;;  %381 = vmatpush.bf16.msra.mxu3 %v1249_v62  ;;  %v1668_v26 = vld [vmem:[#allocation5 + $0xc] sm:$0xf]  ;;  %v1198_v27 = vld [vmem:[#allocation5 + $0x18] sm:$0xf0]  ;;  %v1372_v28 = vld [vmem:[#allocation8 + $0x70] sm:$0xf]  ;;  %v1193_v33 = vor.u32 %v1667_v21, %v1190_v22  ;;  %v1197_v34 = vor.u32 %v1670_v25, %v1196_v24 }
  0x33   :  { %v1714_v29 = vld [vmem:[#allocation8 + $0x74] sm:$0xf0]  ;;  %v1436_v31 = vld [vmem:[#allocation8 + $0xf0] sm:$0xf]  ;;  %v1201_v36 = vor.u32 %v1668_v26, %v1198_v27  ;;  %v1364_v38 = vld [vmem:[#allocation8 + $0x60] sm:$0xf] }
  0x34   :  { %340 = vmatpush.bf16.msra.mxu0 %v1221_v4  ;;  %v1730_v32 = vld [vmem:[#allocation8 + $0xf4] sm:$0xf0]  ;;  %v1373_v37 = vor.u32 %v1714_v29, %v1372_v28  ;;  %v1500_v39 = vld [vmem:[#allocation8 + $0x170] sm:$0xf]  ;;  %v1712_v42 = vld [vmem:[#allocation8 + $0x64] sm:$0xf0] }
  0x35   :  { %354 = vmatpush.bf16.msra.mxu1 %v1225_v5  ;;  %v1666_v35 = vld [vmem:[#allocation2] sm:$0xff]  ;;  %v1437_v41 = vor.u32 %v1730_v32, %v1436_v31  ;;  %v1564_v43 = vld [vmem:[#allocation8 + $0x1f0] sm:$0xf]  ;;  %v1428_v45 = vld [vmem:[#allocation8 + $0xe0] sm:$0xf]  ;;  %v1365_v48 = vor.u32 %v1712_v42, %v1364_v38  ;;  %s1997_s1 = smov [#allocation13]  }
  0x36   :  { %368 = vmatpush.bf16.msra.mxu2 %v1229_v6  ;;  %382 = vmatpush.bf16.msra.mxu3 %v1233_v10  ;;  %v1746_v40 = vld [vmem:[#allocation8 + $0x174] sm:$0xf0]  ;;  %v1728_v46 = vld [vmem:[#allocation8 + $0xe4] sm:$0xf0]  ;;  %v1356_v50 = vld [vmem:[#allocation8 + $0x50] sm:$0xf] }
  0x37   :  { %v1762_v44 = vld [vmem:[#allocation8 + $0x1f4] sm:$0xf0]  ;;  %v1501_v47 = vor.u32 %v1746_v40, %v1500_v39  ;;  %v1492_v51 = vld [vmem:[#allocation8 + $0x160] sm:$0xf]  ;;  %v1744_v52 = vld [vmem:[#allocation8 + $0x164] sm:$0xf0]  ;;  %v1429_v53 = vor.u32 %v1728_v46, %v1428_v45 }
  0x38   :  { %341 = vmatpush.bf16.msra.mxu0 %v1205_v16  ;;  %v1565_v49 = vor.u32 %v1762_v44, %v1564_v43  ;;  %v1710_v54 = vld [vmem:[#allocation8 + $0x54] sm:$0xf0]  ;;  %v1556_v55 = vld [vmem:[#allocation8 + $0x1e0] sm:$0xf]  ;;  %v1760_v56 = vld [vmem:[#allocation8 + $0x1e4] sm:$0xf0]  ;;  %v1493_v59 = vor.u32 %v1744_v52, %v1492_v51 }
  0x39   :  { %355 = vmatpush.bf16.msra.mxu1 %v1209_v18  ;;  %v1420_v57 = vld [vmem:[#allocation8 + $0xd0] sm:$0xf]  ;;  %v1726_v58 = vld [vmem:[#allocation8 + $0xd4] sm:$0xf0]  ;;  %v1357_v60 = vor.u32 %v1710_v54, %v1356_v50  ;;  %v1557_v61 = vor.u32 %v1760_v56, %v1556_v55  ;;  %v1348_v62 = vld [vmem:[#allocation8 + $0x40] sm:$0xf] }
  0x3a   :  { %369 = vmatpush.bf16.msra.mxu2 %v1213_v19  ;;  %383 = vmatpush.bf16.msra.mxu3 %v1217_v23  ;;  %v1484_v63 = vld [vmem:[#allocation8 + $0x150] sm:$0xf]  ;;  %v1742_v0 = vld [vmem:[#allocation8 + $0x154] sm:$0xf0]  ;;  %v1421_v1 = vor.u32 %v1726_v58, %v1420_v57  ;;  %v1708_v2 = vld [vmem:[#allocation8 + $0x44] sm:$0xf0] }
  0x3b   :  { %v1548_v3 = vld [vmem:[#allocation8 + $0x1d0] sm:$0xf]  ;;  %v1758_v4 = vld [vmem:[#allocation8 + $0x1d4] sm:$0xf0]  ;;  %v1412_v5 = vld [vmem:[#allocation8 + $0xc0] sm:$0xf]  ;;  %v1485_v7 = vor.u32 %v1742_v0, %v1484_v63  ;;  %v1349_v9 = vor.u32 %v1708_v2, %v1348_v62 }
  0x3c   :  { %342 = vmatpush.bf16.msra.mxu0 %v1189_v30  ;;  %v1724_v6 = vld [vmem:[#allocation8 + $0xc4] sm:$0xf0]  ;;  %v1340_v8 = vld [vmem:[#allocation8 + $0x30] sm:$0xf]  ;;  %v1549_v10 = vor.u32 %v1758_v4, %v1548_v3  ;;  %v1476_v11 = vld [vmem:[#allocation8 + $0x140] sm:$0xf] }
  0x3d   :  { %356 = vmatpush.bf16.msra.mxu1 %v1193_v33  ;;  %v1740_v12 = vld [vmem:[#allocation8 + $0x144] sm:$0xf0]  ;;  %v1413_v13 = vor.u32 %v1724_v6, %v1412_v5  ;;  %v1706_v14 = vld [vmem:[#allocation8 + $0x34] sm:$0xf0]  ;;  %v1540_v15 = vld [vmem:[#allocation8 + $0x1c0] sm:$0xf] }
  0x3e   :  { %370 = vmatpush.bf16.msra.mxu2 %v1197_v34  ;;  %384 = vmatpush.bf16.msra.mxu3 %v1201_v36  ;;  %v1756_v16 = vld [vmem:[#allocation8 + $0x1c4] sm:$0xf0]  ;;  %v1404_v17 = vld [vmem:[#allocation8 + $0xb0] sm:$0xf]  ;;  %v1722_v18 = vld [vmem:[#allocation8 + $0xb4] sm:$0xf0]  ;;  %v1477_v19 = vor.u32 %v1740_v12, %v1476_v11  ;;  %v1341_v20 = vor.u32 %v1706_v14, %v1340_v8 }
  0x3f   :  { %343 = vmatmul.bf16.vlgmr.msra.gmra.mxu0 %v1666_v35  ;;  %v1541_v21 = vor.u32 %v1756_v16, %v1540_v15  ;;  %v1332_v22 = vld [vmem:[#allocation8 + $0x20] sm:$0xf]  ;;  %v1468_v23 = vld [vmem:[#allocation8 + $0x130] sm:$0xf]  ;;  %v1738_v24 = vld [vmem:[#allocation8 + $0x134] sm:$0xf0]  ;;  %v1405_v25 = vor.u32 %v1722_v18, %v1404_v17 }
  0x40   :  { %793 = vmatpush.bf16.msrb.mxu0 %v1373_v37  ;;  %357 = vmatmul.bf16.vlgmr.msra.gmra.mxu1 %v1666_v35  ;;  %v1704_v26 = vld [vmem:[#allocation8 + $0x24] sm:$0xf0]  ;;  %v1532_v27 = vld [vmem:[#allocation8 + $0x1b0] sm:$0xf]  ;;  %v1754_v28 = vld [vmem:[#allocation8 + $0x1b4] sm:$0xf0]  ;;  %v1469_v31 = vor.u32 %v1738_v24, %v1468_v23 }
  0x41   :  { %807 = vmatpush.bf16.msrb.mxu1 %v1437_v41  ;;  %371 = vmatmul.bf16.vlgmr.msra.gmra.mxu2 %v1666_v35  ;;  %v1396_v29 = vld [vmem:[#allocation8 + $0xa0] sm:$0xf]  ;;  %v1720_v30 = vld [vmem:[#allocation8 + $0xa4] sm:$0xf0]  ;;  %v1333_v32 = vor.u32 %v1704_v26, %v1332_v22  ;;  %v1533_v33 = vor.u32 %v1754_v28, %v1532_v27  ;;  %v1324_v34 = vld [vmem:[#allocation8 + $0x10] sm:$0xf] }
  0x42   :  { %385 = vmatmul.bf16.vlgmr.msra.gmra.mxu3 %v1666_v35  ;;  %821 = vmatpush.bf16.msrb.mxu2 %v1501_v47  ;;  %v1460_v35 = vld [vmem:[#allocation8 + $0x120] sm:$0xf]  ;;  %v1736_v36 = vld [vmem:[#allocation8 + $0x124] sm:$0xf0]  ;;  %v1397_v37 = vor.u32 %v1720_v30, %v1396_v29  ;;  %v1702_v38 = vld [vmem:[#allocation8 + $0x14] sm:$0xf0] }
  0x43   :  { %835 = vmatpush.bf16.msrb.mxu3 %v1565_v49  ;;  %v1524_v39 = vld [vmem:[#allocation8 + $0x1a0] sm:$0xf]  ;;  %v1752_v40 = vld [vmem:[#allocation8 + $0x1a4] sm:$0xf0]  ;;  %v1388_v41 = vld [vmem:[#allocation8 + $0x90] sm:$0xf]  ;;  %v1461_v43 = vor.u32 %v1736_v36, %v1460_v35  ;;  %v1325_v44 = vor.u32 %v1702_v38, %v1324_v34 }
  0x44   :  { %794 = vmatpush.bf16.msrb.mxu0 %v1365_v48  ;;  %v1718_v42 = vld [vmem:[#allocation8 + $0x94] sm:$0xf0]  ;;  %v1525_v45 = vor.u32 %v1752_v40, %v1524_v39  ;;  %v1316_v47 = vld [vmem:[#allocation8] sm:$0xf]  ;;  %v1700_v48 = vld [vmem:[#allocation8 + $0x4] sm:$0xf0] }
  0x45   :  { %808 = vmatpush.bf16.msrb.mxu1 %v1429_v53  ;;  %v1389_v46 = vor.u32 %v1718_v42, %v1388_v41  ;;  %v1380_v49 = vld [vmem:[#allocation8 + $0x80] sm:$0xf]  ;;  %v1716_v50 = vld [vmem:[#allocation8 + $0x84] sm:$0xf0]  ;;  %v1317_v51 = vor.u32 %v1700_v48, %v1316_v47  ;;  %v1713_v53 = vld [vmem:[#allocation8 + $0x74] sm:$0xf] }
  0x46   :  { %822 = vmatpush.bf16.msrb.mxu2 %v1493_v59  ;;  %v1381_v52 = vor.u32 %v1716_v50, %v1380_v49  ;;  %v1374_v54 = vld [vmem:[#allocation8 + $0x78] sm:$0xf0]  ;;  %v1729_v55 = vld [vmem:[#allocation8 + $0xf4] sm:$0xf]  ;;  %v1452_v58 = vld [vmem:[#allocation8 + $0x110] sm:$0xf] }
  0x47   :  { %836 = vmatpush.bf16.msrb.mxu3 %v1557_v61  ;;  %v1377_v56 = vor.u32 %v1713_v53, %v1374_v54  ;;  %v1438_v57 = vld [vmem:[#allocation8 + $0xf8] sm:$0xf0]  ;;  %v1734_v59 = vld [vmem:[#allocation8 + $0x114] sm:$0xf0]  ;;  %v1516_v62 = vld [vmem:[#allocation8 + $0x190] sm:$0xf] }
  0x48   :  { %795 = vmatpush.bf16.msrb.mxu0 %v1357_v60  ;;  %v1441_v60 = vor.u32 %v1729_v55, %v1438_v57  ;;  %v1453_v61 = vor.u32 %v1734_v59, %v1452_v58  ;;  %v1750_v63 = vld [vmem:[#allocation8 + $0x194] sm:$0xf0]  ;;  %v1366_v2 = vld [vmem:[#allocation8 + $0x68] sm:$0xf0]  ;;  %v1727_v4 = vld [vmem:[#allocation8 + $0xe4] sm:$0xf] }
  0x49   :  { %809 = vmatpush.bf16.msrb.mxu1 %v1421_v1  ;;  %v1517_v0 = vor.u32 %v1750_v63, %v1516_v62  ;;  %v1711_v1 = vld [vmem:[#allocation8 + $0x64] sm:$0xf]  ;;  %v1430_v5 = vld [vmem:[#allocation8 + $0xe8] sm:$0xf0]  ;;  %v1444_v6 = vld [vmem:[#allocation8 + $0x100] sm:$0xf] }
  0x4a   :  { %823 = vmatpush.bf16.msrb.mxu2 %v1485_v7  ;;  %v1369_v3 = vor.u32 %v1711_v1, %v1366_v2  ;;  %v1433_v7 = vor.u32 %v1727_v4, %v1430_v5  ;;  %v1732_v8 = vld [vmem:[#allocation8 + $0x104] sm:$0xf0]  ;;  %v1502_v14 = vld [vmem:[#allocation8 + $0x178] sm:$0xf0]  ;;  %v1761_v16 = vld [vmem:[#allocation8 + $0x1f4] sm:$0xf] }
  0x4b   :  { %837 = vmatpush.bf16.msrb.mxu3 %v1549_v10  ;;  %v1748_v10 = vld [vmem:[#allocation8 + $0x184] sm:$0xf0]  ;;  %v1445_v11 = vor.u32 %v1732_v8, %v1444_v6  ;;  %v1566_v17 = vld [vmem:[#allocation8 + $0x1f8] sm:$0xf0]  ;;  %v1709_v18 = vld [vmem:[#allocation8 + $0x54] sm:$0xf] }
  0x4c   :  { %796 = vmatpush.bf16.msrb.mxu0 %v1349_v9  ;;  %v1508_v9 = vld [vmem:[#allocation8 + $0x180] sm:$0xf]  ;;  %v1422_v22 = vld [vmem:[#allocation8 + $0xd8] sm:$0xf0]  ;;  %v1494_v26 = vld [vmem:[#allocation8 + $0x168] sm:$0xf0] }
  0x4d   :  { %810 = vmatpush.bf16.msrb.mxu1 %v1413_v13  ;;  %v1509_v12 = vor.u32 %v1748_v10, %v1508_v9  ;;  %v1745_v13 = vld [vmem:[#allocation8 + $0x174] sm:$0xf]  ;;  %v1759_v28 = vld [vmem:[#allocation8 + $0x1e4] sm:$0xf]  ;;  %v1558_v29 = vld [vmem:[#allocation8 + $0x1e8] sm:$0xf0] }
  0x4e   :  { %824 = vmatpush.bf16.msrb.mxu2 %v1477_v19  ;;  %v1505_v15 = vor.u32 %v1745_v13, %v1502_v14  ;;  %v1569_v19 = vor.u32 %v1761_v16, %v1566_v17  ;;  %v1561_v30 = vor.u32 %v1759_v28, %v1558_v29  ;;  %v1414_v35 = vld [vmem:[#allocation8 + $0xc8] sm:$0xf0]  ;;  %v1486_v38 = vld [vmem:[#allocation8 + $0x158] sm:$0xf0]  ;;  %v1757_v39 = vld [vmem:[#allocation8 + $0x1d4] sm:$0xf] }
  0x4f   :  { %838 = vmatpush.bf16.msrb.mxu3 %v1541_v21  ;;  %v1725_v21 = vld [vmem:[#allocation8 + $0xd4] sm:$0xf]  ;;  %v1550_v41 = vld [vmem:[#allocation8 + $0x1d8] sm:$0xf0]  ;;  %v1739_v49 = vld [vmem:[#allocation8 + $0x144] sm:$0xf] }
  0x50   :  { %797 = vmatpush.bf16.msrb.mxu0 %v1341_v20  ;;  %v1358_v20 = vld [vmem:[#allocation8 + $0x58] sm:$0xf0]  ;;  %v1425_v24 = vor.u32 %v1725_v21, %v1422_v22  ;;  %v1553_v42 = vor.u32 %v1757_v39, %v1550_v41  ;;  %v1478_v50 = vld [vmem:[#allocation8 + $0x148] sm:$0xf0]  ;;  %v1703_v55 = vld [vmem:[#allocation8 + $0x24] sm:$0xf] }
  0x51   :  { %811 = vmatpush.bf16.msrb.mxu1 %v1405_v25  ;;  %v1361_v23 = vor.u32 %v1709_v18, %v1358_v20  ;;  %v1743_v25 = vld [vmem:[#allocation8 + $0x164] sm:$0xf]  ;;  %v1406_v47 = vld [vmem:[#allocation8 + $0xb8] sm:$0xf0]  ;;  %v1542_v53 = vld [vmem:[#allocation8 + $0x1c8] sm:$0xf0] }
  0x52   :  { %825 = vmatpush.bf16.msrb.mxu2 %v1469_v31  ;;  %v1497_v27 = vor.u32 %v1743_v25, %v1494_v26  ;;  %v1707_v31 = vld [vmem:[#allocation8 + $0x44] sm:$0xf]  ;;  %v1398_v59 = vld [vmem:[#allocation8 + $0xa8] sm:$0xf0]  ;;  %v1470_v62 = vld [vmem:[#allocation8 + $0x138] sm:$0xf0] }
  0x53   :  { %839 = vmatpush.bf16.msrb.mxu3 %v1533_v33  ;;  %v1723_v33 = vld [vmem:[#allocation8 + $0xc4] sm:$0xf]  ;;  %v1753_v63 = vld [vmem:[#allocation8 + $0x1b4] sm:$0xf]  ;;  %v1534_v1 = vld [vmem:[#allocation8 + $0x1b8] sm:$0xf0] }
  0x54   :  { %798 = vmatpush.bf16.msrb.mxu0 %v1333_v32  ;;  %v1350_v32 = vld [vmem:[#allocation8 + $0x48] sm:$0xf0]  ;;  %v1417_v36 = vor.u32 %v1723_v33, %v1414_v35  ;;  %v1719_v57 = vld [vmem:[#allocation8 + $0xa4] sm:$0xf]  ;;  %v1537_v2 = vor.u32 %v1753_v63, %v1534_v1  ;;  %v1326_v4 = vld [vmem:[#allocation8 + $0x18] sm:$0xf0] }
  0x55   :  { %812 = vmatpush.bf16.msrb.mxu1 %v1397_v37  ;;  %v1353_v34 = vor.u32 %v1707_v31, %v1350_v32  ;;  %v1741_v37 = vld [vmem:[#allocation8 + $0x154] sm:$0xf]  ;;  %v1735_v8 = vld [vmem:[#allocation8 + $0x124] sm:$0xf]  ;;  %v1462_v9 = vld [vmem:[#allocation8 + $0x128] sm:$0xf0] }
  0x56   :  { %826 = vmatpush.bf16.msrb.mxu2 %v1461_v43  ;;  %v1489_v40 = vor.u32 %v1741_v37, %v1486_v38  ;;  %v1705_v43 = vld [vmem:[#allocation8 + $0x34] sm:$0xf]  ;;  %v1526_v13 = vld [vmem:[#allocation8 + $0x1a8] sm:$0xf0]  ;;  %v1699_v14 = vld [vmem:[#allocation8 + $0x4] sm:$0xf] }
  0x57   :  { %840 = vmatpush.bf16.msrb.mxu3 %v1525_v45  ;;  %v1721_v45 = vld [vmem:[#allocation8 + $0xb4] sm:$0xf]  ;;  %v1318_v16 = vld [vmem:[#allocation8 + $0x8] sm:$0xf0]  ;;  %v1715_v17 = vld [vmem:[#allocation8 + $0x84] sm:$0xf] }
  0x58   :  { %799 = vmatpush.bf16.msrb.mxu0 %v1325_v44  ;;  %v1342_v44 = vld [vmem:[#allocation8 + $0x38] sm:$0xf0]  ;;  %v1409_v48 = vor.u32 %v1721_v45, %v1406_v47  ;;  %v1717_v5 = vld [vmem:[#allocation8 + $0x94] sm:$0xf]  ;;  %v1382_v18 = vld [vmem:[#allocation8 + $0x88] sm:$0xf0] }
  0x59   :  { %813 = vmatpush.bf16.msrb.mxu1 %v1389_v46  ;;  %v1345_v46 = vor.u32 %v1705_v43, %v1342_v44  ;;  %v1385_v20 = vor.u32 %v1715_v17, %v1382_v18  ;;  %v1733_v21 = vld [vmem:[#allocation8 + $0x114] sm:$0xf]  ;;  %v1454_v22 = vld [vmem:[#allocation8 + $0x118] sm:$0xf0]  ;;  %v1731_v29 = vld [vmem:[#allocation8 + $0x104] sm:$0xf] }
  0x5a   :  { %827 = vmatpush.bf16.msrb.mxu2 %v1453_v61  ;;  %v1737_v61 = vld [vmem:[#allocation8 + $0x134] sm:$0xf]  ;;  %v1457_v25 = vor.u32 %v1733_v21, %v1454_v22  ;;  %v1747_v31 = vld [vmem:[#allocation8 + $0x184] sm:$0xf]  ;;  %v1510_v35 = vld [vmem:[#allocation8 + $0x188] sm:$0xf0] }
  0x5b   :  { %841 = vmatpush.bf16.msrb.mxu3 %v1517_v0  ;;  %v1473_v0 = vor.u32 %v1737_v61, %v1470_v62  ;;  %v1513_v37 = vor.u32 %v1747_v31, %v1510_v35  ;;  %v467_v17 = vld [vmem:[%s2094_s4] sm:$0x3]  ;;  %v1771_v22 = vld [vmem:[#allocation10 + $0x40] sm:$0xff]  ;;  %s1164_s23 = sshll.u32 %s1997_s1, 4  ;;  %s1166_s25 = sshll.u32 %s2099_s9, 4  ;;  %s1165_s23 = int_to_ptr.vmem [resolvable:$true] %s1164_s23  ;;  %s1167_s25 = int_to_ptr.hbm [resolvable:$true] %s1166_s25 }
  0x5c   :  { %800 = vmatpush.bf16.msrb.mxu0 %v1317_v51  ;;  %v1755_v51 = vld [vmem:[#allocation8 + $0x1c4] sm:$0xf] }
  0x5d   :  { %814 = vmatpush.bf16.msrb.mxu1 %v1381_v52  ;;  %v1481_v52 = vor.u32 %v1739_v49, %v1478_v50  ;;  %v1545_v54 = vor.u32 %v1755_v51, %v1542_v53 }
  0x5e   :  { %828 = vmatpush.bf16.msrb.mxu2 %v1445_v11  ;;  %v1465_v11 = vor.u32 %v1735_v8, %v1462_v9  ;;  %v1765_v8 = vld [vmem:[#allocation10 + $0x10] sm:$0xff] }
  0x5f   :  { %842 = vmatpush.bf16.msrb.mxu3 %v1509_v12  ;;  %v1751_v12 = vld [vmem:[#allocation8 + $0x1a4] sm:$0xf]  ;;  %v1777_v9 = vld [vmem:[#allocation10 + $0x70] sm:$0xff] }
  0x60   :  { %849 = vmatpush.bf16.msra.mxu0 %v1377_v56  ;;  %v1334_v56 = vld [vmem:[#allocation8 + $0x28] sm:$0xf0] }
  0x61   :  { %863 = vmatpush.bf16.msra.mxu1 %v1441_v60  ;;  %v1337_v58 = vor.u32 %v1703_v55, %v1334_v56  ;;  %v1401_v60 = vor.u32 %v1719_v57, %v1398_v59 }
  0x62   :  { %877 = vmatpush.bf16.msra.mxu2 %v1505_v15  ;;  %v1529_v15 = vor.u32 %v1751_v12, %v1526_v13  ;;  %v1763_v12 = vld [vmem:[#allocation10] sm:$0xff] }
  0x63   :  { %891 = vmatpush.bf16.msra.mxu3 %v1569_v19  ;;  %v1321_v19 = vor.u32 %v1699_v14, %v1318_v16  ;;  %v1775_v13 = vld [vmem:[#allocation10 + $0x60] sm:$0xff]  ;;  %v1774_v14 = vld [vmem:[#allocation10 + $0x58] sm:$0xff]  ;;  %v1773_v16 = vld [vmem:[#allocation10 + $0x50] sm:$0xff] }
  0x64   :  { %850 = vmatpush.bf16.msra.mxu0 %v1369_v3  ;;  %v1701_v3 = vld [vmem:[#allocation8 + $0x14] sm:$0xf] }
  0x65   :  { %864 = vmatpush.bf16.msra.mxu1 %v1433_v7  ;;  %v1329_v6 = vor.u32 %v1701_v3, %v1326_v4  ;;  %v1390_v7 = vld [vmem:[#allocation8 + $0x98] sm:$0xf0]  ;;  %v1769_v3 = vld [vmem:[#allocation10 + $0x30] sm:$0xff]  ;;  %v1768_v4 = vld [vmem:[#allocation10 + $0x28] sm:$0xff] }
  0x66   :  { %878 = vmatpush.bf16.msra.mxu2 %v1497_v27  ;;  %v1393_v10 = vor.u32 %v1717_v5, %v1390_v7  ;;  %v159_v27 = vld [vmem:[#allocation7] sm:$0xf]  ;;  %v1767_v5 = vld [vmem:[#allocation10 + $0x20] sm:$0xff] }
  0x67   :  { %892 = vmatpush.bf16.msra.mxu3 %v1561_v30  ;;  %v1446_v30 = vld [vmem:[#allocation8 + $0x108] sm:$0xf0]  ;;  %v161_v32 = vperm.slane %v159_v27, 0  ;;  %v163_v47 = vperm.slane %v159_v27, 2  ;;  %v164_v49 = vperm.slane %v159_v27, 3  ;;  %v1778_v7 = vld [vmem:[#allocation10 + $0x78] sm:$0xff] }
  0x68   :  { %851 = vmatpush.bf16.msra.mxu0 %v1361_v23  ;;  %v1749_v23 = vld [vmem:[#allocation8 + $0x194] sm:$0xf] }
  0x69   :  { %865 = vmatpush.bf16.msra.mxu1 %v1425_v24  ;;  %v1518_v24 = vld [vmem:[#allocation8 + $0x198] sm:$0xf0] }
  0x6a   :  { %879 = vmatpush.bf16.msra.mxu2 %v1489_v40  ;;  %v1521_v26 = vor.u32 %v1749_v23, %v1518_v24 }
  0x6b   :  { %893 = vmatpush.bf16.msra.mxu3 %v1553_v42 }
  0x6c   :  { %852 = vmatpush.bf16.msra.mxu0 %v1353_v34  ;;  %v1449_v34 = vor.u32 %v1731_v29, %v1446_v30 }
  0x6d   :  { %866 = vmatpush.bf16.msra.mxu1 %v1417_v36  ;;  %v162_v36 = vperm.slane %v159_v27, 1 }
  0x6e   :  { %880 = vmatpush.bf16.msra.mxu2 %v1481_v52  ;;  %v1770_v52 = vld [vmem:[#allocation10 + $0x38] sm:$0xff] }
  0x6f   :  { %894 = vmatpush.bf16.msra.mxu3 %v1545_v54 }
  0x70   :  { %853 = vmatpush.bf16.msra.mxu0 %v1345_v46 }
  0x71   :  { %867 = vmatpush.bf16.msra.mxu1 %v1409_v48 }
  0x72   :  { %881 = vmatpush.bf16.msra.mxu2 %v1473_v0 }
  0x73   :  { %895 = vmatpush.bf16.msra.mxu3 %v1537_v2 }
  0x74   :  { %854 = vmatpush.bf16.msra.mxu0 %v1337_v58 }
  0x75   :  { %868 = vmatpush.bf16.msra.mxu1 %v1401_v60 }
  0x76   :  { %882 = vmatpush.bf16.msra.mxu2 %v1465_v11  ;;  %v1776_v11 = vld [vmem:[#allocation10 + $0x68] sm:$0xff] }
  0x77   :  { %896 = vmatpush.bf16.msra.mxu3 %v1529_v15 }
  0x78   :  { %855 = vmatpush.bf16.msra.mxu0 %v1329_v6  ;;  %v1766_v6 = vld [vmem:[#allocation10 + $0x18] sm:$0xff] }
  0x79   :  { %869 = vmatpush.bf16.msra.mxu1 %v1393_v10  ;;  %v1764_v10 = vld [vmem:[#allocation10 + $0x8] sm:$0xff] }
  0x7a   :  { %883 = vmatpush.bf16.msra.mxu2 %v1457_v25 }
  0x7b   :  { %897 = vmatpush.bf16.msra.mxu3 %v1521_v26 }
  0x7c   :  { %856 = vmatpush.bf16.msra.mxu0 %v1321_v19  ;;  %v1772_v19 = vld [vmem:[#allocation10 + $0x48] sm:$0xff] }
  0x7d   :  { %870 = vmatpush.bf16.msra.mxu1 %v1385_v20  ;;  %v469_v20 = vperm.slane %v467_v17, 0 }
  0x7e   :  { %884 = vmatpush.bf16.msra.mxu2 %v1449_v34 }
  0x7f   :  { %898 = vmatpush.bf16.msra.mxu3 %v1513_v37 }
  0xbc   :  { %v344_v28 = vpop.f32.mrf.mxu0 }
  0xbd   :  { %v358_v33 = vpop.f32.mrf.mxu1  ;;  %v345_v38 = vadd.f32 %v344_v28, %v161_v32 }
  0xbe   :  { %v359_v39 = vadd.f32 %v358_v33, %v162_v36 }
  0xbf   :  { %v391_v43 = vmax.f32 %v345_v38, 0.0 }
  0xc0   :  { %v392_v46 = vmax.f32 %v359_v39, 0.0 }
  0xc4   :  { %v372_v40 = vpop.f32.mrf.mxu2  ;;  %v346_v42 = vpop.f32.mrf.mxu0 }
  0xc5   :  { %v386_v41 = vpop.f32.mrf.mxu3  ;;  %v347_v44 = vadd.f32 %v346_v42, %v161_v32  ;;  %v360_v45 = vpop.f32.mrf.mxu1  ;;  %v373_v54 = vadd.f32 %v372_v40, %v163_v47 }
  0xc6   :  { %v361_v48 = vadd.f32 %v360_v45, %v162_v36  ;;  %v387_v56 = vadd.f32 %v386_v41, %v164_v49  ;;  %v470_v36 = vperm.slane %v467_v17, 1 }
  0xc7   :  { %v395_v50 = vmax.f32 %v347_v44, 0.0  ;;  %v393_v61 = vmax.f32 %v373_v54, 0.0 }
  0xc8   :  { %v396_v51 = vmax.f32 %v361_v48, 0.0  ;;  %v394_v63 = vmax.f32 %v387_v56, 0.0 }
  0xc9   :  { %v399_v53 = vpack.c.bf16 %v395_v50, %v391_v43 }
  0xca   :  { %v400_v55 = vpack.c.bf16 %v396_v51, %v392_v46 }
  0xcb   :  { %801 = vmatmul.bf16.vlgmr.msrb.gmra.mxu0 %v399_v53 }
  0xcc   :  { %v374_v57 = vpop.f32.mrf.mxu2  ;;  %815 = vmatmul.bf16.vlgmr.msrb.gmra.mxu1 %v400_v55  ;;  %1043 = vmatpush.bf16.msrb.mxu0 %v1770_v52 }
  0xcd   :  { %v375_v58 = vadd.f32 %v374_v57, %v163_v47  ;;  %v388_v59 = vpop.f32.mrf.mxu3  ;;  %1057 = vmatpush.bf16.msrb.mxu1 %v1778_v7 }
  0xce   :  { %v389_v60 = vadd.f32 %v388_v59, %v164_v49  ;;  %v1786_v59 = vld [vmem:[#allocation11 + $0x38] sm:$0xff] }
  0xcf   :  { %v397_v62 = vmax.f32 %v375_v58, 0.0 }
  0xd0   :  { %v398_v0 = vmax.f32 %v389_v60, 0.0  ;;  %1044 = vmatpush.bf16.msrb.mxu0 %v1769_v3  ;;  %v1785_v60 = vld [vmem:[#allocation11 + $0x30] sm:$0xff] }
  0xd1   :  { %v401_v1 = vpack.c.bf16 %v397_v62, %v393_v61  ;;  %1058 = vmatpush.bf16.msrb.mxu1 %v1777_v9  ;;  %v1784_v61 = vld [vmem:[#allocation11 + $0x28] sm:$0xff]  ;;  %v1783_v62 = vld [vmem:[#allocation11 + $0x20] sm:$0xff] }
  0xd2   :  { %v402_v2 = vpack.c.bf16 %v398_v0, %v394_v63  ;;  %v1782_v63 = vld [vmem:[#allocation11 + $0x18] sm:$0xff]  ;;  %v1781_v0 = vld [vmem:[#allocation11 + $0x10] sm:$0xff] }
  0xd3   :  { %829 = vmatmul.bf16.vlgmr.msrb.gmra.mxu2 %v401_v1 }
  0xd4   :  { %843 = vmatmul.bf16.vlgmr.msrb.gmra.mxu3 %v402_v2  ;;  %1045 = vmatpush.bf16.msrb.mxu0 %v1768_v4 }
  0xd5   :  { %1059 = vmatpush.bf16.msrb.mxu1 %v1776_v11  ;;  %1142 = vmatpush.bf16.msrb.mxu2 %v1786_v59 }
  0xd8   :  { %1046 = vmatpush.bf16.msrb.mxu0 %v1767_v5  ;;  %v1805_v5 = vld [vmem:[%s2096_s6] ss:$0 sm:$0xff] }
  0xd9   :  { %1060 = vmatpush.bf16.msrb.mxu1 %v1775_v13  ;;  %1143 = vmatpush.bf16.msrb.mxu2 %v1785_v60 }
  0xdb   :  { %857 = vmatmul.bf16.vlgmr.msra.gmra.mxu0 %v399_v53 }
  0xdc   :  { %871 = vmatmul.bf16.vlgmr.msra.gmra.mxu1 %v400_v55  ;;  %1047 = vmatpush.bf16.msrb.mxu0 %v1766_v6 }
  0xdd   :  { %1061 = vmatpush.bf16.msrb.mxu1 %v1774_v14  ;;  %1144 = vmatpush.bf16.msrb.mxu2 %v1784_v61 }
  0xe0   :  { %1048 = vmatpush.bf16.msrb.mxu0 %v1765_v8 }
  0xe1   :  { %1062 = vmatpush.bf16.msrb.mxu1 %v1773_v16  ;;  %1145 = vmatpush.bf16.msrb.mxu2 %v1783_v62  ;;  %v1806_v16 = vld [vmem:[%s2098_s8] ss:$0 sm:$0xff] }
  0xe3   :  { %885 = vmatmul.bf16.vlgmr.msra.gmra.mxu2 %v401_v1  ;;  %v1780_v1 = vld [vmem:[#allocation11 + $0x8] sm:$0xff] }
  0xe4   :  { %899 = vmatmul.bf16.vlgmr.msra.gmra.mxu3 %v402_v2  ;;  %1049 = vmatpush.bf16.msrb.mxu0 %v1764_v10  ;;  %v1779_v2 = vld [vmem:[#allocation11] sm:$0xff] }
  0xe5   :  { %1063 = vmatpush.bf16.msrb.mxu1 %v1772_v19  ;;  %1146 = vmatpush.bf16.msrb.mxu2 %v1782_v63 }
  0xe8   :  { %1050 = vmatpush.bf16.msrb.mxu0 %v1763_v12 }
  0xe9   :  { %1064 = vmatpush.bf16.msrb.mxu1 %v1771_v22  ;;  %1147 = vmatpush.bf16.msrb.mxu2 %v1781_v0 }
  0xed   :  { %1148 = vmatpush.bf16.msrb.mxu2 %v1780_v1 }
  0xf1   :  { %1149 = vmatpush.bf16.msrb.mxu2 %v1779_v2 }
 0x148   :  { %v802_v15 = vpop.f32.mrf.mxu0 }
 0x149   :  { %v816_v18 = vpop.f32.mrf.mxu1  ;;  %v803_v23 = vadd.f32 %v802_v15, %v469_v20 }
 0x14b   :  { %v817_v27 = vadd.f32 %v816_v18, %v803_v23 }
 0x150   :  { %v804_v21 = vpop.f32.mrf.mxu0 }
 0x151   :  { %v818_v26 = vpop.f32.mrf.mxu1  ;;  %v805_v28 = vadd.f32 %v804_v21, %v469_v20 }
 0x153   :  { %v819_v31 = vadd.f32 %v818_v26, %v805_v28 }
 0x156   :  { %v830_v24 = vpop.f32.mrf.mxu2 }
 0x157   :  { %v844_v25 = vpop.f32.mrf.mxu3  ;;  %v831_v29 = vadd.f32 %v830_v24, %v817_v27 }
 0x158   :  { %v858_v30 = vpop.f32.mrf.mxu0 }
 0x159   :  { %v845_v33 = vadd.f32 %v844_v25, %v831_v29  ;;  %v872_v38 = vpop.f32.mrf.mxu1  ;;  %v859_v41 = vadd.f32 %v858_v30, %v470_v36 }
 0x15b   :  { %v905_v39 = vmax.f32 %v845_v33, 0.0  ;;  %v873_v46 = vadd.f32 %v872_v38, %v859_v41 }
 0x15e   :  { %v832_v32 = vpop.f32.mrf.mxu2 }
 0x15f   :  { %v833_v34 = vadd.f32 %v832_v32, %v819_v31  ;;  %v846_v35 = vpop.f32.mrf.mxu3 }
 0x160   :  { %v860_v43 = vpop.f32.mrf.mxu0 }
 0x161   :  { %v847_v37 = vadd.f32 %v846_v35, %v833_v34  ;;  %v861_v47 = vadd.f32 %v860_v43, %v470_v36  ;;  %v874_v49 = vpop.f32.mrf.mxu1 }
 0x163   :  { %v907_v40 = vmax.f32 %v847_v37, 0.0  ;;  %v875_v50 = vadd.f32 %v874_v49, %v861_v47 }
 0x165   :  { %v909_v42 = vpack.c.bf16 %v907_v40, %v905_v39 }
 0x166   :  { %v886_v44 = vpop.f32.mrf.mxu2 }
 0x167   :  { %v900_v45 = vpop.f32.mrf.mxu3  ;;  %1051 = vmatmul.bf16.vlgmr.msrb.gmra.mxu0 %v909_v42  ;;  %v887_v48 = vadd.f32 %v886_v44, %v873_v46 }
 0x169   :  { %v901_v52 = vadd.f32 %v900_v45, %v887_v48 }
 0x16b   :  { %v906_v56 = vmax.f32 %v901_v52, 0.0 }
 0x16e   :  { %v888_v51 = vpop.f32.mrf.mxu2 }
 0x16f   :  { %v889_v53 = vadd.f32 %v888_v51, %v875_v50  ;;  %v902_v54 = vpop.f32.mrf.mxu3 }
 0x171   :  { %v903_v55 = vadd.f32 %v902_v54, %v889_v53 }
 0x173   :  { %v908_v57 = vmax.f32 %v903_v55, 0.0 }
 0x175   :  { %v910_v58 = vpack.c.bf16 %v908_v57, %v906_v56 }
 0x177   :  { %1065 = vmatmul.bf16.vlgmr.msrb.gmra.mxu1 %v910_v58 }
 0x1e4   :  { %v1052_v3 = vpop.f32.mrf.mxu0 }
 0x1e5   :  { %v1053_v7 = vadd.f32 %v1805_v5, %v1052_v3 }
 0x1ec   :  { %v1054_v6 = vpop.f32.mrf.mxu0 }
 0x1ed   :  { %v1055_v8 = vadd.f32 %v1805_v5, %v1054_v6 }
 0x1f4   :  { %v1066_v4 = vpop.f32.mrf.mxu1 }
 0x1f5   :  { %v1067_v9 = vadd.f32 %v1066_v4, %v1053_v7 }
 0x1f7   :  { %v1071_v12 = vmax.f32 %v1067_v9, 0.0 }
 0x1fc   :  { %v1068_v10 = vpop.f32.mrf.mxu1 }
 0x1fd   :  { %v1069_v11 = vadd.f32 %v1068_v10, %v1055_v8 }
 0x1ff   :  { %v1072_v13 = vmax.f32 %v1069_v11, 0.0 }
 0x201   :  { %v1073_v14 = vpack.c.bf16 %v1072_v13, %v1071_v12 }
 0x203   :  { %1150 = vmatmul.bf16.vlgmr.msrb.gmra.mxu2 %v1073_v14 }
 0x286   :  { %v1151_v15 = vpop.f32.mrf.mxu2 }
 0x287   :  { %v1152_v18 = vadd.f32 %v1806_v16, %v1151_v15 }
 0x28e   :  { %v1153_v17 = vpop.f32.mrf.mxu2 }
 0x28f   :  { %v1154_v19 = vadd.f32 %v1806_v16, %v1153_v17 }
 0x291   :  { %v1790_v20 = vpack.c.bf16 %v1154_v19, %v1152_v18 }
 0x293   :  { %1791 = vst [vmem:[#allocation13] sm:$0xff] %v1790_v20  }
 0x294   :  { %1172 = dma.vmem_to_hbm [thread:$0]  %s1165_s23, 128, %s1167_s25, [#allocation4], %s1992_s29, %s1992_s29, %s1993_s30  }
 0x295   :  { %1983 = dma.done.wait [#allocation4], 128  }
 0x296   :  { %1984 = vsyncadd [#allocation4], 4294967168 }
 0x297   :  { %1177 = vsyncpa [#allocation3], 1 }
 0x298   :  { %1178 = vsyncpa [#allocation6], 1 }
 0x299   :  { %1179 = vsyncpa [#allocation9], 1 }
 0x29a   :  { %1180 = vsyncpa [#allocation12], 1 }
 0x29b   :  { %1181 = vsyncpa [#allocation4], 1 }

</bundles_post_ra>
